<compile_context>
chip_gen: v6e
topology: v6e:2x2x1
jax: 0.10.0
libtpu: 0.0.40
codegen_flags: <defaults>
</compile_context>

<pallas_src>
import functools

import jax
import jax.numpy as jnp
from jax.experimental import pallas as pl
from jax.experimental.pallas import tpu as pltpu

HIDDEN = 200
OUT = 10
LANE = 128
SUBLANE = 8


def _round_up(x, m):
    return ((x + m - 1) // m) * m


def _fast_elementwise_dtype():
    """bf16 elementwise/output on bf16-capable VPUs (v6e/v7x), f32 otherwise (v5e)."""
    try:
        kind = jax.devices()[0].device_kind.lower()
    except Exception:
        return jnp.float32
    if "v6" in kind or "v7" in kind:
        return jnp.bfloat16
    return jnp.float32


def twonn_kernel(x_ref, w1_ref, b1_ref, w2_ref, b2_ref, w3_ref, b3_ref, o_ref,
                 *, eltwise_dtype):
    wdt = w1_ref.dtype                      # bf16 matmul operands, f32 MXU accumulate
    zero = jnp.zeros((), eltwise_dtype)

    # fc1 + ReLU (x cast to bf16 on the VPU; elementwise in eltwise_dtype)
    h1 = jnp.dot(x_ref[...].astype(wdt), w1_ref[...],
                 preferred_element_type=jnp.float32)
    h1 = jnp.maximum(h1.astype(eltwise_dtype) + b1_ref[...].astype(eltwise_dtype),
                     zero)
    # fc2 + ReLU
    h2 = jnp.dot(h1.astype(wdt), w2_ref[...],
                 preferred_element_type=jnp.float32)
    h2 = jnp.maximum(h2.astype(eltwise_dtype) + b2_ref[...].astype(eltwise_dtype),
                     zero)
    # fc3 (no activation); final bias add in f32, store in o_ref's dtype
    out = jnp.dot(h2.astype(wdt), w3_ref[...],
                  preferred_element_type=jnp.float32) + b3_ref[...]
    o_ref[...] = out.astype(o_ref.dtype)


def init_params(key, input_size, hidden=HIDDEN, out=OUT):
    """f32 'logical' params mimicking nn.Linear's uniform(-1/sqrt(fan_in), ...).
    Stored transposed as (in, out) so the kernel computes x @ W + b."""
    ks = jax.random.split(key, 6)

    def linear(kw, kb, fan_in, fan_out):
        bound = 1.0 / jnp.sqrt(jnp.float32(fan_in))
        w = jax.random.uniform(kw, (fan_in, fan_out), jnp.float32, -bound, bound)
        b = jax.random.uniform(kb, (1, fan_out), jnp.float32, -bound, bound)
        return w, b

    w1, b1 = linear(ks[0], ks[1], input_size, hidden)
    w2, b2 = linear(ks[2], ks[3], hidden, hidden)
    w3, b3 = linear(ks[4], ks[5], hidden, out)
    return {"w1": w1, "b1": b1, "w2": w2, "b2": b2, "w3": w3, "b3": b3}


def prepare_padded_params(params):
    """Zero-pad feature dims to lane-dense multiples of 128 (hidden 200->256,
    out 10->128) and cast matmul weights to bf16; biases stay f32 (cast in-kernel
    when the elementwise path is bf16).  Zero padding keeps the sliced-back output
    exact in exact arithmetic: padded hidden columns see relu(0 + 0) = 0 and padded
    weight rows are 0."""
    in_dim, hidden = params["w1"].shape
    out_dim = params["w3"].shape[1]
    in_p = _round_up(in_dim, LANE)
    h_p = _round_up(hidden, LANE)
    out_p = _round_up(out_dim, LANE)   # keep at 128 — don't widen fc3 (review note)

    def pad(a, shape):
        return jnp.zeros(shape, a.dtype).at[: a.shape[0], : a.shape[1]].set(a)

    padded = {
        "w1": pad(params["w1"], (in_p, h_p)).astype(jnp.bfloat16),
        "b1": pad(params["b1"], (1, h_p)),
        "w2": pad(params["w2"], (h_p, h_p)).astype(jnp.bfloat16),
        "b2": pad(params["b2"], (1, h_p)),
        "w3": pad(params["w3"], (h_p, out_p)).astype(jnp.bfloat16),
        "b3": pad(params["b3"], (1, out_p)),
    }
    return padded, (in_dim, out_dim)


def twonn_forward(x_nchw, padded_params, out_dim=OUT, b_tile=1024):
    """x_nchw: [B, C, H, W] float32. padded_params: from prepare_padded_params.
    b_tile: batch rows per grid step (sweep 512-1024; multiple of 8)."""
    B = x_nchw.shape[0]
    x_flat = x_nchw.reshape(B, -1)          # same row-major flatten as torch .view
    in_dim = x_flat.shape[1]

    w1, b1 = padded_params["w1"], padded_params["b1"]
    w2, b2 = padded_params["w2"], padded_params["b2"]
    w3, b3 = padded_params["w3"], padded_params["b3"]
    in_p, h_p = w1.shape
    out_p = w3.shape[1]
    assert in_p >= in_dim

    # Tile selection: minimize batch padding (at most n_tiles*8 extra rows).
    b8 = _round_up(B, SUBLANE)
    n_tiles = pl.cdiv(b8, b_tile)
    bt = _round_up(pl.cdiv(b8, n_tiles), SUBLANE)
    b_pad = n_tiles * bt

    if b_pad == B and in_p == in_dim:
        # Fast path: no wrapper-side pad/cast pass — x is DMA'd once in its
        # native dtype, cast to bf16 on the VPU inside the kernel.
        x_in = x_flat
    else:
        # Slow path only when alignment actually requires it (tiny B, ragged B,
        # or input_size not a multiple of 128).
        x_in = jnp.zeros((b_pad, in_p), x_flat.dtype).at[:B, :in_dim].set(x_flat)

    eltwise_dtype = _fast_elementwise_dtype()
    out_dtype = eltwise_dtype               # bf16 output halves writeback on v6e/v7x

    grid = (b_pad // bt,)
    resident = pl.Buffered(1)               # constant index_map -> single buffer

    x_bytes = jnp.dtype(x_in.dtype).itemsize
    out_bytes = jnp.dtype(out_dtype).itemsize
    flops = 2 * b_pad * (in_p * h_p + h_p * h_p + h_p * out_p)
    bytes_accessed = (
        x_in.size * x_bytes
        + (w1.size + w2.size + w3.size) * 2
        + (b1.size + b2.size + b3.size) * 4
        + b_pad * out_p * out_bytes
    )

    out = pl.pallas_call(
        functools.partial(twonn_kernel, eltwise_dtype=eltwise_dtype),
        out_shape=jax.ShapeDtypeStruct((b_pad, out_p), out_dtype),
        grid_spec=pl.GridSpec(
            grid=grid,
            in_specs=[
                # activations: tiled along the batch grid axis (pipelined)
                pl.BlockSpec((bt, in_p), lambda i: (i, 0)),
                # weights / biases: constant index map, VMEM-resident, single buffer
                pl.BlockSpec((in_p, h_p), lambda i: (0, 0), pipeline_mode=resident),
                pl.BlockSpec((1, h_p), lambda i: (0, 0), pipeline_mode=resident),
                pl.BlockSpec((h_p, h_p), lambda i: (0, 0), pipeline_mode=resident),
                pl.BlockSpec((1, h_p), lambda i: (0, 0), pipeline_mode=resident),
                pl.BlockSpec((h_p, out_p), lambda i: (0, 0), pipeline_mode=resident),
                pl.BlockSpec((1, out_p), lambda i: (0, 0), pipeline_mode=resident),
            ],
            out_specs=pl.BlockSpec((bt, out_p), lambda i: (i, 0)),
        ),
        compiler_params=pltpu.CompilerParams(
            # TODO(synk): verify on v7x that the batch axis actually shards across
            # both TensorCores; if xprof shows one TC idle, switch this axis to
            # pltpu.CORE_PARALLEL (with an even number of batch tiles).
            dimension_semantics=("parallel",),
            # bt=1024 double-buffered f32 x (~8 MiB) + intermediates: raise the
            # scoped VMEM limit so v5e's 16 MiB default doesn't reject it.
            vmem_limit_bytes=32 * 1024 * 1024,
        ),
        cost_estimate=pl.CostEstimate(
            flops=int(flops), transcendentals=0, bytes_accessed=int(bytes_accessed)
        ),
    )(x_in, w1, b1, w2, b2, w3, b3)

    # Slice away batch / output-channel padding; hand back f32 logits.
    return out[:B, :out_dim].astype(jnp.float32)


def reference_forward(x_nchw, params):
    """Pure-JAX f32 reference matching the PyTorch module."""
    B = x_nchw.shape[0]
    x = x_nchw.reshape(B, -1)
    x = jnp.maximum(x @ params["w1"] + params["b1"], 0.0)
    x = jnp.maximum(x @ params["w2"] + params["b2"], 0.0)
    return x @ params["w3"] + params["b3"]


if __name__ == "__main__":
    key = jax.random.PRNGKey(0)
    k_x, k_p = jax.random.split(key)

    B, C, H, W = 2, 4, 16, 16          # input_size = C*H*W = 1024
    input_size = C * H * W

    x = jax.random.normal(k_x, (B, C, H, W), jnp.float32)
    params = init_params(k_p, input_size)
    padded_params, (_, out_dim) = prepare_padded_params(params)

    y = twonn_forward(x, padded_params, out_dim=out_dim)
    y = jax.block_until_ready(y)

    y_ref = reference_forward(x, params)
    assert y.shape == (B, OUT)
    # bf16 matmul operands / elementwise with f32 MXU accumulation -> loosened tol.
    assert jnp.allclose(y, y_ref, atol=5e-2, rtol=5e-2), float(
        jnp.max(jnp.abs(y - y_ref))
    )

    print("KERNEL_OK")
</pallas_src>

<mosaic_0001>
module attributes {stable_mosaic.version = 11 : i64} {
  func.func @twonn_kernel(%arg0: i32, %arg1: memref<8x1024xf32, #tpu.memory_space<vmem>>, %arg2: memref<1024x256xbf16, #tpu.memory_space<vmem>>, %arg3: memref<1x256xf32, #tpu.memory_space<vmem>>, %arg4: memref<256x256xbf16, #tpu.memory_space<vmem>>, %arg5: memref<1x256xf32, #tpu.memory_space<vmem>>, %arg6: memref<256x128xbf16, #tpu.memory_space<vmem>>, %arg7: memref<1x128xf32, #tpu.memory_space<vmem>>, %arg8: memref<8x128xf32, #tpu.memory_space<vmem>>) attributes {dimension_semantics = [#tpu.dimension_semantics<parallel>], iteration_bounds = array<i64: 1>, scalar_prefetch = 0 : i64, scratch_operands = 0 : i64, tpu.core_type = #tpu.core_type<tc>, window_params = [{transform_indices = @transform_0, window_bounds = array<i64: 8, 1024>}, {pipeline_mode = #tpu.pipeline_mode<synchronous>, transform_indices = @transform_1, window_bounds = array<i64: 1024, 256>}, {pipeline_mode = #tpu.pipeline_mode<synchronous>, transform_indices = @transform_2, window_bounds = array<i64: 1, 256>}, {pipeline_mode = #tpu.pipeline_mode<synchronous>, transform_indices = @transform_3, window_bounds = array<i64: 256, 256>}, {pipeline_mode = #tpu.pipeline_mode<synchronous>, transform_indices = @transform_4, window_bounds = array<i64: 1, 256>}, {pipeline_mode = #tpu.pipeline_mode<synchronous>, transform_indices = @transform_5, window_bounds = array<i64: 256, 128>}, {pipeline_mode = #tpu.pipeline_mode<synchronous>, transform_indices = @transform_6, window_bounds = array<i64: 1, 128>}, {transform_indices = @transform_7, window_bounds = array<i64: 8, 128>}]} {
    %c0 = arith.constant 0 : index
    %c0_0 = arith.constant 0 : index
    %0 = vector.load %arg1[%c0, %c0_0] : memref<8x1024xf32, #tpu.memory_space<vmem>>, vector<8x1024xf32>
    %1 = arith.truncf %0 : vector<8x1024xf32> to vector<8x1024xbf16>
    %c0_1 = arith.constant 0 : index
    %c0_2 = arith.constant 0 : index
    %2 = vector.load %arg2[%c0_1, %c0_2] : memref<1024x256xbf16, #tpu.memory_space<vmem>>, vector<1024x256xbf16>
    %cst = arith.constant dense<0.000000e+00> : vector<8x256xf32>
    %3 = tpu.matmul %1, %2, %cst {dimension_numbers = #tpu.dot_dimension_numbers<[1], [0], [0], [1], [0, 0, 1, 1], [], []>} : vector<8x1024xbf16>, vector<1024x256xbf16>, vector<8x256xf32> -> vector<8x256xf32>
    %c0_3 = arith.constant 0 : index
    %c0_4 = arith.constant 0 : index
    %4 = vector.load %arg3[%c0_3, %c0_4] : memref<1x256xf32, #tpu.memory_space<vmem>>, vector<1x256xf32>
    %5 = vector.broadcast %4 : vector<1x256xf32> to vector<8x256xf32>
    %6 = arith.addf %3, %5 : vector<8x256xf32>
    %cst_5 = arith.constant 0.000000e+00 : f32
    %7 = vector.broadcast %cst_5 : f32 to vector<8x256xf32>
    %8 = arith.maximumf %6, %7 : vector<8x256xf32>
    %9 = arith.truncf %8 : vector<8x256xf32> to vector<8x256xbf16>
    %c0_6 = arith.constant 0 : index
    %c0_7 = arith.constant 0 : index
    %10 = vector.load %arg4[%c0_6, %c0_7] : memref<256x256xbf16, #tpu.memory_space<vmem>>, vector<256x256xbf16>
    %cst_8 = arith.constant dense<0.000000e+00> : vector<8x256xf32>
    %11 = tpu.matmul %9, %10, %cst_8 {dimension_numbers = #tpu.dot_dimension_numbers<[1], [0], [0], [1], [0, 0, 1, 1], [], []>} : vector<8x256xbf16>, vector<256x256xbf16>, vector<8x256xf32> -> vector<8x256xf32>
    %c0_9 = arith.constant 0 : index
    %c0_10 = arith.constant 0 : index
    %12 = vector.load %arg5[%c0_9, %c0_10] : memref<1x256xf32, #tpu.memory_space<vmem>>, vector<1x256xf32>
    %13 = vector.broadcast %12 : vector<1x256xf32> to vector<8x256xf32>
    %14 = arith.addf %11, %13 : vector<8x256xf32>
    %cst_11 = arith.constant 0.000000e+00 : f32
    %15 = vector.broadcast %cst_11 : f32 to vector<8x256xf32>
    %16 = arith.maximumf %14, %15 : vector<8x256xf32>
    %17 = arith.truncf %16 : vector<8x256xf32> to vector<8x256xbf16>
    %c0_12 = arith.constant 0 : index
    %c0_13 = arith.constant 0 : index
    %18 = vector.load %arg6[%c0_12, %c0_13] : memref<256x128xbf16, #tpu.memory_space<vmem>>, vector<256x128xbf16>
    %cst_14 = arith.constant dense<0.000000e+00> : vector<8x128xf32>
    %19 = tpu.matmul %17, %18, %cst_14 {dimension_numbers = #tpu.dot_dimension_numbers<[1], [0], [0], [1], [0, 0, 1, 1], [], []>} : vector<8x256xbf16>, vector<256x128xbf16>, vector<8x128xf32> -> vector<8x128xf32>
    %c0_15 = arith.constant 0 : index
    %c0_16 = arith.constant 0 : index
    %20 = vector.load %arg7[%c0_15, %c0_16] : memref<1x128xf32, #tpu.memory_space<vmem>>, vector<1x128xf32>
    %21 = vector.broadcast %20 : vector<1x128xf32> to vector<8x128xf32>
    %22 = arith.addf %19, %21 : vector<8x128xf32>
    %c0_17 = arith.constant 0 : index
    %c0_18 = arith.constant 0 : index
    %23 = vector.load %arg8[%c0_17, %c0_18] : memref<8x128xf32, #tpu.memory_space<vmem>>, vector<8x128xf32>
    tpu.vector_store %arg8[%c0_17, %c0_18], %22 {strides = array<i32>} : memref<8x128xf32, #tpu.memory_space<vmem>>, vector<8x128xf32>,
    return
  }
  func.func @transform_0(%arg0: i32) -> (i32, i32) {
    %c0_i32 = arith.constant 0 : i32
    %c0_i32_0 = arith.constant 0 : i32
    return %arg0, %c0_i32 : i32, i32
  }
  func.func @transform_1(%arg0: i32) -> (i32, i32) {
    %c0_i32 = arith.constant 0 : i32
    %c0_i32_0 = arith.constant 0 : i32
    %c0_i32_1 = arith.constant 0 : i32
    return %c0_i32, %c0_i32_0 : i32, i32
  }
  func.func @transform_2(%arg0: i32) -> (i32, i32) {
    %c0_i32 = arith.constant 0 : i32
    %c0_i32_0 = arith.constant 0 : i32
    %c0_i32_1 = arith.constant 0 : i32
    return %c0_i32, %c0_i32_0 : i32, i32
  }
  func.func @transform_3(%arg0: i32) -> (i32, i32) {
    %c0_i32 = arith.constant 0 : i32
    %c0_i32_0 = arith.constant 0 : i32
    %c0_i32_1 = arith.constant 0 : i32
    return %c0_i32, %c0_i32_0 : i32, i32
  }
  func.func @transform_4(%arg0: i32) -> (i32, i32) {
    %c0_i32 = arith.constant 0 : i32
    %c0_i32_0 = arith.constant 0 : i32
    %c0_i32_1 = arith.constant 0 : i32
    return %c0_i32, %c0_i32_0 : i32, i32
  }
  func.func @transform_5(%arg0: i32) -> (i32, i32) {
    %c0_i32 = arith.constant 0 : i32
    %c0_i32_0 = arith.constant 0 : i32
    %c0_i32_1 = arith.constant 0 : i32
    return %c0_i32, %c0_i32_0 : i32, i32
  }
  func.func @transform_6(%arg0: i32) -> (i32, i32) {
    %c0_i32 = arith.constant 0 : i32
    %c0_i32_0 = arith.constant 0 : i32
    %c0_i32_1 = arith.constant 0 : i32
    return %c0_i32, %c0_i32_0 : i32, i32
  }
  func.func @transform_7(%arg0: i32) -> (i32, i32) {
    %c0_i32 = arith.constant 0 : i32
    %c0_i32_0 = arith.constant 0 : i32
    return %arg0, %c0_i32 : i32, i32
  }
}

</mosaic_0001>

<bundles_post_ra>
// kernel: tpu_custom_call.1
= control target key start
LH: loop header
LB: loop body
LE: loop exit
PB: predicated region body
PF: predicated region fallthrough
CT: control target
= control target key end

     0   :  { %12 = vsyncpa [#allocation3], 0  ;;  %s2132_s0 = inlined_call_operand.hbm [shape: f32[8,1024], index: 0, kind: input, shape index: {}]   ;;  %s2133_s1 = inlined_call_operand.hbm [shape: bf16[1024,256], index: 1, kind: input, shape index: {}]   ;;  %s2134_s2 = inlined_call_operand.vmem [shape: f32[1,256], index: 2, kind: input, shape index: {}]   ;;  %s2135_s3 = inlined_call_operand.hbm [shape: bf16[256,256], index: 3, kind: input, shape index: {}]   ;;  %s2136_s4 = inlined_call_operand.vmem [shape: f32[1,256], index: 4, kind: input, shape index: {}]   ;;  %s2137_s5 = inlined_call_operand.hbm [shape: bf16[256,128], index: 5, kind: input, shape index: {}]   ;;  %s2138_s6 = inlined_call_operand.vmem [shape: f32[1,128], index: 6, kind: input, shape index: {}]   ;;  %s2139_s7 = inlined_call_operand.hbm [shape: f32[8,128], index: 7, kind: output, shape index: {}]  }
   0x1   :  { %13 = vsyncpa [#allocation6], 0 }
   0x2   :  { %14 = vsyncpa [#allocation9], 0 }
   0x3   :  { %15 = vsyncpa [#allocation4], 0  ;;  %s2059_s24 = smov [#allocation5]  }
   0x4   :  { %s31_s25 = sshll.u32 %s2059_s24, 4  ;;  %s32_s25 = int_to_ptr.vmem [resolvable:$true] %s31_s25 }
   0x5   :  { %s1959_s26 = scalar_lea.vmem %s32_s25, 16384  ;;  %p1964_p1 = scmp.lt.s32.totalorder %s32_s25, %s32_s25 }
   0x6   :  { %p1960_p0 = scmp.ne.s32.totalorder %s32_s25, %s1959_s26  ;;  %p1965_p2 = scmp.lt.s32.totalorder %s1959_s26, %s1959_s26 }
   0x8   :  { %p1966_p3 = por %p1965_p2, %p1964_p1 }
   0xa   :  { %p1967_p4 = pnand %p1966_p3, %p1960_p0 }
   0xc   :  { %1970 = shalt.err (!%p1967_p4)
}
   0xd   :  { %s2060_s27 = smov 128   ;;  %s2061_s28 = smov 8  }
   0xe   :  { %37 = dma.hbm_to_vmem [thread:$0]  %s2133_s1, 16384, %s32_s25, [#allocation6], %s2060_s27, %s2060_s27, %s2061_s28  }
   0xf   :  { %s2062_s8 = smov [#allocation2]   ;;  %s2063_s10 = smov [#allocation7]  }
  0x10   :  { %s22_s9 = sshll.u32 %s2062_s8, 4  ;;  %s45_s11 = sshll.u32 %s2063_s10, 4  ;;  %s23_s9 = int_to_ptr.vmem [resolvable:$true] %s22_s9  ;;  %s46_s11 = int_to_ptr.vmem [resolvable:$true] %s45_s11 }
  0x11   :  { %s1979_s12 = scalar_lea.vmem %s23_s9, 1024  ;;  %p1984_p6 = scmp.lt.s32.totalorder %s23_s9, %s23_s9 }
  0x12   :  { %p1980_p5 = scmp.ne.s32.totalorder %s23_s9, %s1979_s12  ;;  %p1985_p7 = scmp.lt.s32.totalorder %s1979_s12, %s1979_s12 }
  0x14   :  { %p1986_p8 = por %p1985_p7, %p1984_p6 }
  0x16   :  { %p1987_p9 = pnand %p1986_p8, %p1980_p5 }
  0x18   :  { %1990 = shalt.err (!%p1987_p9)
}
  0x19   :  { %25 = dma.hbm_to_vmem [thread:$0]  %s2132_s0, 1024, %s23_s9, [#allocation3]  }
  0x1a   :  { %s1999_s15 = scalar_lea.vmem %s46_s11, 4096  ;;  %p2004_p11 = scmp.lt.s32.totalorder %s46_s11, %s46_s11 }
  0x1b   :  { %p2000_p10 = scmp.ne.s32.totalorder %s46_s11, %s1999_s15  ;;  %p2005_p12 = scmp.lt.s32.totalorder %s1999_s15, %s1999_s15 }
  0x1d   :  { %p2006_p13 = por %p2005_p12, %p2004_p11 }
  0x1f   :  { %p2007_p0 = pnand %p2006_p13, %p2000_p10 }
  0x21   :  { %2010 = shalt.err (!%p2007_p0)
}
  0x22   :  { %51 = dma.hbm_to_vmem [thread:$0]  %s2135_s3, 4096, %s46_s11, [#allocation6], %s2060_s27, %s2060_s27, %s2061_s28  }
  0x23   :  { %s2064_s17 = smov [#allocation8]  }
  0x24   :  { %s59_s18 = sshll.u32 %s2064_s17, 4  ;;  %s60_s18 = int_to_ptr.vmem [resolvable:$true] %s59_s18 }
  0x25   :  { %s2019_s19 = scalar_lea.vmem %s60_s18, 2048  ;;  %p2024_p2 = scmp.lt.s32.totalorder %s60_s18, %s60_s18 }
  0x26   :  { %p2020_p1 = scmp.ne.s32.totalorder %s60_s18, %s2019_s19  ;;  %p2025_p3 = scmp.lt.s32.totalorder %s2019_s19, %s2019_s19 }
  0x28   :  { %p2026_p4 = por %p2025_p3, %p2024_p2 }
  0x2a   :  { %p2027_p5 = pnand %p2026_p4, %p2020_p1 }
  0x2c   :  { %2030 = shalt.err (!%p2027_p5)
}
  0x2d   :  { %s2065_s0 = smov 64   ;;  %s2066_s20 = smov 4  }
  0x2e   :  { %65 = dma.hbm_to_vmem [thread:$0]  %s2137_s5, 2048, %s60_s18, [#allocation9], %s2065_s0, %s2065_s0, %s2066_s20  }
  0x2f   :  { %2051 = dma.done.wait [#allocation3], 1024  }
  0x30   :  { %2052 = vsyncadd [#allocation3], 4294966272 }
  0x31   :  { %2053 = dma.done.wait [#allocation6], 20480  }
  0x32   :  { %2054 = vsyncadd [#allocation6], 4294946816 }
  0x33   :  { %2055 = dma.done.wait [#allocation9], 2048  }
  0x34   :  { %2056 = vsyncadd [#allocation9], 4294965248  ;;  %v1695_v0 = vld [vmem:[#allocation5 + $0x74] ss:$8 sps:$4 sm:$0xff]   ;;  %v1699_v2 = vld [vmem:[#allocation5 + $0x70] ss:$8 sps:$4 sm:$0xff]  }
  0x35   :  { %v1697_v1 = vld [vmem:[#allocation5 + $0x174] ss:$8 sps:$4 sm:$0xff]   ;;  %877 = vmatprep.subr.bf16.mxu0 %v1695_v0  ;;  %v1700_v3 = vld [vmem:[#allocation5 + $0x170] ss:$8 sps:$4 sm:$0xff]   ;;  %v1701_v4 = vld [vmem:[#allocation5 + $0x64] ss:$8 sps:$4 sm:$0xff]  }
  0x36   :  { %918 = vmatprep.subr.bf16.mxu1 %v1697_v1  ;;  %878 = vmatpush1.bf16.msra.mxu0 %v1699_v2  ;;  %v1703_v5 = vld [vmem:[#allocation5 + $0x164] ss:$8 sps:$4 sm:$0xff]   ;;  %v1705_v6 = vld [vmem:[#allocation5 + $0x60] ss:$8 sps:$4 sm:$0xff]   ;;  %v1707_v8 = vld [vmem:[#allocation5 + $0x54] ss:$8 sps:$4 sm:$0xff]  }
  0x37   :  { %919 = vmatpush1.bf16.msra.mxu1 %v1700_v3  ;;  %879 = vmatprep.subr.bf16.mxu0 %v1701_v4  ;;  %v1706_v7 = vld [vmem:[#allocation5 + $0x160] ss:$8 sps:$4 sm:$0xff]   ;;  %v1709_v9 = vld [vmem:[#allocation5 + $0x154] ss:$8 sps:$4 sm:$0xff]   ;;  %v1711_v10 = vld [vmem:[#allocation5 + $0x50] ss:$8 sps:$4 sm:$0xff]  }
  0x38   :  { %920 = vmatprep.subr.bf16.mxu1 %v1703_v5  ;;  %v1712_v11 = vld [vmem:[#allocation5 + $0x150] ss:$8 sps:$4 sm:$0xff]   ;;  %v1713_v12 = vld [vmem:[#allocation5 + $0x44] ss:$8 sps:$4 sm:$0xff]   ;;  %v1717_v14 = vld [vmem:[#allocation5 + $0x40] ss:$8 sps:$4 sm:$0xff]  }
  0x39   :  { %v1715_v13 = vld [vmem:[#allocation5 + $0x144] ss:$8 sps:$4 sm:$0xff]   ;;  %v1718_v15 = vld [vmem:[#allocation5 + $0x140] ss:$8 sps:$4 sm:$0xff]   ;;  %v1719_v16 = vld [vmem:[#allocation5 + $0x34] ss:$8 sps:$4 sm:$0xff]  }
  0x3a   :  { %880 = vmatpush1.bf16.msra.mxu0 %v1705_v6  ;;  %v1721_v17 = vld [vmem:[#allocation5 + $0x134] ss:$8 sps:$4 sm:$0xff]   ;;  %v1723_v18 = vld [vmem:[#allocation5 + $0x30] ss:$8 sps:$4 sm:$0xff]   ;;  %v1725_v20 = vld [vmem:[#allocation5 + $0x24] ss:$8 sps:$4 sm:$0xff]  }
  0x3b   :  { %921 = vmatpush1.bf16.msra.mxu1 %v1706_v7  ;;  %881 = vmatprep.subr.bf16.mxu0 %v1707_v8  ;;  %v1724_v19 = vld [vmem:[#allocation5 + $0x130] ss:$8 sps:$4 sm:$0xff]   ;;  %v1727_v21 = vld [vmem:[#allocation5 + $0x124] ss:$8 sps:$4 sm:$0xff]   ;;  %v1729_v22 = vld [vmem:[#allocation5 + $0x20] ss:$8 sps:$4 sm:$0xff]  }
  0x3c   :  { %922 = vmatprep.subr.bf16.mxu1 %v1709_v9  ;;  %v1730_v23 = vld [vmem:[#allocation5 + $0x120] ss:$8 sps:$4 sm:$0xff]   ;;  %v1731_v24 = vld [vmem:[#allocation5 + $0x14] ss:$8 sps:$4 sm:$0xff]   ;;  %v1735_v26 = vld [vmem:[#allocation5 + $0x10] ss:$8 sps:$4 sm:$0xff]  }
  0x3d   :  { %v1733_v25 = vld [vmem:[#allocation5 + $0x114] ss:$8 sps:$4 sm:$0xff]   ;;  %v1736_v27 = vld [vmem:[#allocation5 + $0x110] ss:$8 sps:$4 sm:$0xff]   ;;  %v1737_v28 = vld [vmem:[#allocation5 + $0x4] ss:$8 sps:$4 sm:$0xff]  }
  0x3e   :  { %882 = vmatpush1.bf16.msra.mxu0 %v1711_v10  ;;  %v1739_v29 = vld [vmem:[#allocation5 + $0x104] ss:$8 sps:$4 sm:$0xff]   ;;  %v1741_v30 = vld [vmem:[#allocation5] ss:$8 sps:$4 sm:$0xff]   ;;  %v1743_v32 = vld [vmem:[#allocation5 + $0xf4] ss:$8 sps:$4 sm:$0xff]  }
  0x3f   :  { %923 = vmatpush1.bf16.msra.mxu1 %v1712_v11  ;;  %883 = vmatprep.subr.bf16.mxu0 %v1713_v12  ;;  %v1742_v31 = vld [vmem:[#allocation5 + $0x100] ss:$8 sps:$4 sm:$0xff]   ;;  %v1745_v33 = vld [vmem:[#allocation5 + $0x1f4] ss:$8 sps:$4 sm:$0xff]   ;;  %v1747_v34 = vld [vmem:[#allocation5 + $0xf0] ss:$8 sps:$4 sm:$0xff]  }
  0x40   :  { %924 = vmatprep.subr.bf16.mxu1 %v1715_v13  ;;  %v1748_v35 = vld [vmem:[#allocation5 + $0x1f0] ss:$8 sps:$4 sm:$0xff]   ;;  %v1749_v36 = vld [vmem:[#allocation5 + $0xe4] ss:$8 sps:$4 sm:$0xff]   ;;  %v1753_v38 = vld [vmem:[#allocation5 + $0xe0] ss:$8 sps:$4 sm:$0xff]  }
  0x41   :  { %v1751_v37 = vld [vmem:[#allocation5 + $0x1e4] ss:$8 sps:$4 sm:$0xff]   ;;  %v1754_v39 = vld [vmem:[#allocation5 + $0x1e0] ss:$8 sps:$4 sm:$0xff]   ;;  %v1755_v40 = vld [vmem:[#allocation5 + $0xd4] ss:$8 sps:$4 sm:$0xff]  }
  0x42   :  { %884 = vmatpush1.bf16.msra.mxu0 %v1717_v14  ;;  %v1757_v41 = vld [vmem:[#allocation5 + $0x1d4] ss:$8 sps:$4 sm:$0xff]   ;;  %v1759_v42 = vld [vmem:[#allocation5 + $0xd0] ss:$8 sps:$4 sm:$0xff]   ;;  %v1761_v44 = vld [vmem:[#allocation5 + $0xc4] ss:$8 sps:$4 sm:$0xff]  }
  0x43   :  { %925 = vmatpush1.bf16.msra.mxu1 %v1718_v15  ;;  %885 = vmatprep.subr.bf16.mxu0 %v1719_v16  ;;  %v1760_v43 = vld [vmem:[#allocation5 + $0x1d0] ss:$8 sps:$4 sm:$0xff]   ;;  %v1763_v45 = vld [vmem:[#allocation5 + $0x1c4] ss:$8 sps:$4 sm:$0xff]   ;;  %v1765_v47 = vld [vmem:[#allocation5 + $0xc0] ss:$8 sps:$4 sm:$0xff]  }
  0x44   :  { %926 = vmatprep.subr.bf16.mxu1 %v1721_v17  ;;  %v82_v46 = vld [vmem:[#allocation2 + $0x8] sm:$0xff]  ;;  %v84_v50 = vld [vmem:[#allocation2 + $0x18] sm:$0xff]  ;;  %v81_v4 = vld [vmem:[#allocation2] sm:$0xff] }
  0x45   :  { %v1766_v48 = vld [vmem:[#allocation5 + $0x1c0] ss:$8 sps:$4 sm:$0xff]   ;;  %v90_v49 = vpack.c.bf16 %v82_v46, %v82_v46  ;;  %v1767_v51 = vld [vmem:[#allocation5 + $0xb4] ss:$8 sps:$4 sm:$0xff]   ;;  %v92_v52 = vpack.c.bf16 %v84_v50, %v84_v50  ;;  %v1771_v54 = vld [vmem:[#allocation5 + $0xb0] ss:$8 sps:$4 sm:$0xff]   ;;  %v89_v8 = vpack.c.bf16 %v81_v4, %v81_v4 }
  0x46   :  { %886 = vmatpush1.bf16.msra.mxu0 %v1723_v18  ;;  %v1769_v53 = vld [vmem:[#allocation5 + $0x1b4] ss:$8 sps:$4 sm:$0xff]   ;;  %v1772_v55 = vld [vmem:[#allocation5 + $0x1b0] ss:$8 sps:$4 sm:$0xff]   ;;  %v1773_v56 = vld [vmem:[#allocation5 + $0xa4] ss:$8 sps:$4 sm:$0xff]  }
  0x47   :  { %927 = vmatpush1.bf16.msra.mxu1 %v1724_v19  ;;  %887 = vmatprep.subr.bf16.mxu0 %v1725_v20  ;;  %v1775_v57 = vld [vmem:[#allocation5 + $0x1a4] ss:$8 sps:$4 sm:$0xff]   ;;  %v1777_v58 = vld [vmem:[#allocation5 + $0xa0] ss:$8 sps:$4 sm:$0xff]   ;;  %v1779_v60 = vld [vmem:[#allocation5 + $0x94] ss:$8 sps:$4 sm:$0xff]  }
  0x48   :  { %928 = vmatprep.subr.bf16.mxu1 %v1727_v21  ;;  %909 = vmatprep.mubr.bf16.mxu0 %v90_v49  ;;  %v1778_v59 = vld [vmem:[#allocation5 + $0x1a0] ss:$8 sps:$4 sm:$0xff]   ;;  %v1781_v61 = vld [vmem:[#allocation5 + $0x194] ss:$8 sps:$4 sm:$0xff]   ;;  %v1783_v62 = vld [vmem:[#allocation5 + $0x90] ss:$8 sps:$4 sm:$0xff]  }
  0x49   :  { %950 = vmatprep.mubr.bf16.mxu1 %v92_v52  ;;  %v1784_v63 = vld [vmem:[#allocation5 + $0x190] ss:$8 sps:$4 sm:$0xff]   ;;  %v1785_v0 = vld [vmem:[#allocation5 + $0x84] ss:$8 sps:$4 sm:$0xff]   ;;  %v1789_v2 = vld [vmem:[#allocation5 + $0x80] ss:$8 sps:$4 sm:$0xff]  }
  0x4a   :  { %888 = vmatpush1.bf16.msra.mxu0 %v1729_v22  ;;  %v1787_v1 = vld [vmem:[#allocation5 + $0x184] ss:$8 sps:$4 sm:$0xff]   ;;  %v1790_v3 = vld [vmem:[#allocation5 + $0x180] ss:$8 sps:$4 sm:$0xff]   ;;  %v83_v5 = vld [vmem:[#allocation2 + $0x10] sm:$0xff] }
  0x4b   :  { %929 = vmatpush1.bf16.msra.mxu1 %v1730_v23  ;;  %889 = vmatprep.subr.bf16.mxu0 %v1731_v24  ;;  %v1793_v6 = vld [vmem:[#allocation5 + $0x274] ss:$8 sps:$4 sm:$0xff]   ;;  %v91_v9 = vpack.c.bf16 %v83_v5, %v83_v5  ;;  %v1791_v10 = vld [vmem:[#allocation5 + $0x270] ss:$8 sps:$4 sm:$0xff]   ;;  %v1799_v12 = vld [vmem:[#allocation5 + $0x264] ss:$8 sps:$4 sm:$0xff]  }
  0x4c   :  { %930 = vmatprep.subr.bf16.mxu1 %v1733_v25  ;;  %v1796_v7 = vld [vmem:[#allocation5 + $0x374] ss:$8 sps:$4 sm:$0xff]   ;;  %v1794_v11 = vld [vmem:[#allocation5 + $0x370] ss:$8 sps:$4 sm:$0xff]   ;;  %v1802_v13 = vld [vmem:[#allocation5 + $0x364] ss:$8 sps:$4 sm:$0xff]  }
  0x4d   :  { %v1797_v14 = vld [vmem:[#allocation5 + $0x260] ss:$8 sps:$4 sm:$0xff]   ;;  %v1805_v16 = vld [vmem:[#allocation5 + $0x254] ss:$8 sps:$4 sm:$0xff]   ;;  %v1803_v18 = vld [vmem:[#allocation5 + $0x250] ss:$8 sps:$4 sm:$0xff]  }
  0x4e   :  { %890 = vmatpush1.bf16.msra.mxu0 %v1735_v26  ;;  %v1800_v15 = vld [vmem:[#allocation5 + $0x360] ss:$8 sps:$4 sm:$0xff]   ;;  %v1808_v17 = vld [vmem:[#allocation5 + $0x354] ss:$8 sps:$4 sm:$0xff]   ;;  %v1806_v19 = vld [vmem:[#allocation5 + $0x350] ss:$8 sps:$4 sm:$0xff]  }
  0x4f   :  { %931 = vmatpush1.bf16.msra.mxu1 %v1736_v27  ;;  %891 = vmatprep.subr.bf16.mxu0 %v1737_v28  ;;  %v1811_v20 = vld [vmem:[#allocation5 + $0x244] ss:$8 sps:$4 sm:$0xff]   ;;  %v1809_v22 = vld [vmem:[#allocation5 + $0x240] ss:$8 sps:$4 sm:$0xff]   ;;  %v1817_v24 = vld [vmem:[#allocation5 + $0x234] ss:$8 sps:$4 sm:$0xff]  }
  0x50   :  { %932 = vmatprep.subr.bf16.mxu1 %v1739_v29  ;;  %v1814_v21 = vld [vmem:[#allocation5 + $0x344] ss:$8 sps:$4 sm:$0xff]   ;;  %v1812_v23 = vld [vmem:[#allocation5 + $0x340] ss:$8 sps:$4 sm:$0xff]   ;;  %v1820_v25 = vld [vmem:[#allocation5 + $0x334] ss:$8 sps:$4 sm:$0xff]  }
  0x51   :  { %v1815_v26 = vld [vmem:[#allocation5 + $0x230] ss:$8 sps:$4 sm:$0xff]   ;;  %v1823_v28 = vld [vmem:[#allocation5 + $0x224] ss:$8 sps:$4 sm:$0xff]   ;;  %v1845_v50 = vld [vmem:[#allocation5 + $0x2e0] ss:$8 sps:$4 sm:$0xff]  }
  0x52   :  { %892 = vmatpush1.bf16.msra.mxu0 %v1741_v30  ;;  %v1818_v27 = vld [vmem:[#allocation5 + $0x330] ss:$8 sps:$4 sm:$0xff]   ;;  %v1826_v29 = vld [vmem:[#allocation5 + $0x324] ss:$8 sps:$4 sm:$0xff]   ;;  %v1821_v30 = vld [vmem:[#allocation5 + $0x220] ss:$8 sps:$4 sm:$0xff]  }
  0x53   :  { %933 = vmatpush1.bf16.msra.mxu1 %v1742_v31  ;;  %893 = vmatprep.subr.bf16.mxu0 %v1743_v32  ;;  %v1824_v31 = vld [vmem:[#allocation5 + $0x320] ss:$8 sps:$4 sm:$0xff]   ;;  %v1829_v32 = vld [vmem:[#allocation5 + $0x214] ss:$8 sps:$4 sm:$0xff]   ;;  %v1839_v46 = vld [vmem:[#allocation5 + $0x2f0] ss:$8 sps:$4 sm:$0xff]  }
  0x54   :  { %934 = vmatprep.subr.bf16.mxu1 %v1745_v33  ;;  %v1832_v33 = vld [vmem:[#allocation5 + $0x314] ss:$8 sps:$4 sm:$0xff]   ;;  %v1850_v49 = vld [vmem:[#allocation5 + $0x3e4] ss:$8 sps:$4 sm:$0xff]  }
  0x55   :  { %v1853_v52 = vld [vmem:[#allocation5 + $0x2d4] ss:$8 sps:$4 sm:$0xff]  }
  0x56   :  { %894 = vmatpush2.bf16.msra.mxu0 %v1747_v34  ;;  %v1827_v34 = vld [vmem:[#allocation5 + $0x210] ss:$8 sps:$4 sm:$0xff]   ;;  %v1877_v4 = vld [vmem:[#allocation5 + $0x294] ss:$8 sps:$4 sm:$0xff]  }
  0x57   :  { %935 = vmatpush2.bf16.msra.mxu1 %v1748_v35  ;;  %895 = vmatprep.subr.bf16.mxu0 %v1749_v36  ;;  %v86_v35 = vld [vmem:[#allocation2 + $0x28] sm:$0xff]  ;;  %v1830_v36 = vld [vmem:[#allocation5 + $0x310] ss:$8 sps:$4 sm:$0xff]   ;;  %v1880_v5 = vld [vmem:[#allocation5 + $0x394] ss:$8 sps:$4 sm:$0xff]  }
  0x58   :  { %936 = vmatprep.subr.bf16.mxu1 %v1751_v37  ;;  %v1835_v37 = vld [vmem:[#allocation5 + $0x204] ss:$8 sps:$4 sm:$0xff]  }
  0x5a   :  { %896 = vmatpush2.bf16.msra.mxu0 %v1753_v38  ;;  %v94_v38 = vpack.c.bf16 %v86_v35, %v86_v35  ;;  %v1914_v35 = vld [vmem:[#allocation7 + $0xe0] ss:$8 sps:$4 sm:$0xff]  }
  0x5b   :  { %937 = vmatpush2.bf16.msra.mxu1 %v1754_v39  ;;  %897 = vmatprep.subr.bf16.mxu0 %v1755_v40  ;;  %v88_v39 = vld [vmem:[#allocation2 + $0x38] sm:$0xff]  ;;  %v1838_v40 = vld [vmem:[#allocation5 + $0x304] ss:$8 sps:$4 sm:$0xff]  }
  0x5c   :  { %938 = vmatprep.subr.bf16.mxu1 %v1757_v41  ;;  %v96_v41 = vpack.c.bf16 %v88_v39, %v88_v39  ;;  %v1920_v39 = vld [vmem:[#allocation7 + $0xc0] ss:$8 sps:$4 sm:$0xff]  }
  0x5e   :  { %898 = vmatpush2.bf16.msra.mxu0 %v1759_v42  ;;  %v1833_v42 = vld [vmem:[#allocation5 + $0x200] ss:$8 sps:$4 sm:$0xff]  }
  0x5f   :  { %939 = vmatpush2.bf16.msra.mxu1 %v1760_v43  ;;  %899 = vmatprep.subr.bf16.mxu0 %v1761_v44  ;;  %v1836_v43 = vld [vmem:[#allocation5 + $0x300] ss:$8 sps:$4 sm:$0xff]   ;;  %v1841_v44 = vld [vmem:[#allocation5 + $0x2f4] ss:$8 sps:$4 sm:$0xff]  }
  0x60   :  { %940 = vmatprep.subr.bf16.mxu1 %v1763_v45  ;;  %v1844_v45 = vld [vmem:[#allocation5 + $0x3f4] ss:$8 sps:$4 sm:$0xff]  }
  0x62   :  { %900 = vmatpush2.bf16.msra.mxu0 %v1765_v47  ;;  %v1842_v47 = vld [vmem:[#allocation5 + $0x3f0] ss:$8 sps:$4 sm:$0xff]  }
  0x63   :  { %941 = vmatpush2.bf16.msra.mxu1 %v1766_v48  ;;  %901 = vmatprep.subr.bf16.mxu0 %v1767_v51  ;;  %v1847_v48 = vld [vmem:[#allocation5 + $0x2e4] ss:$8 sps:$4 sm:$0xff]   ;;  %v1848_v51 = vld [vmem:[#allocation5 + $0x3e0] ss:$8 sps:$4 sm:$0xff]  }
  0x64   :  { %942 = vmatprep.subr.bf16.mxu1 %v1769_v53  ;;  %v1856_v53 = vld [vmem:[#allocation5 + $0x3d4] ss:$8 sps:$4 sm:$0xff]  }
  0x66   :  { %902 = vmatpush2.bf16.msra.mxu0 %v1771_v54  ;;  %v1851_v54 = vld [vmem:[#allocation5 + $0x2d0] ss:$8 sps:$4 sm:$0xff]  }
  0x67   :  { %943 = vmatpush2.bf16.msra.mxu1 %v1772_v55  ;;  %903 = vmatprep.subr.bf16.mxu0 %v1773_v56  ;;  %v1854_v55 = vld [vmem:[#allocation5 + $0x3d0] ss:$8 sps:$4 sm:$0xff]   ;;  %v1859_v56 = vld [vmem:[#allocation5 + $0x2c4] ss:$8 sps:$4 sm:$0xff]  }
  0x68   :  { %944 = vmatprep.subr.bf16.mxu1 %v1775_v57  ;;  %v1862_v57 = vld [vmem:[#allocation5 + $0x3c4] ss:$8 sps:$4 sm:$0xff]  }
  0x6a   :  { %904 = vmatpush2.bf16.msra.mxu0 %v1777_v58  ;;  %v1857_v58 = vld [vmem:[#allocation5 + $0x2c0] ss:$8 sps:$4 sm:$0xff]  }
  0x6b   :  { %945 = vmatpush2.bf16.msra.mxu1 %v1778_v59  ;;  %905 = vmatprep.subr.bf16.mxu0 %v1779_v60  ;;  %v1860_v59 = vld [vmem:[#allocation5 + $0x3c0] ss:$8 sps:$4 sm:$0xff]   ;;  %v1865_v60 = vld [vmem:[#allocation5 + $0x2b4] ss:$8 sps:$4 sm:$0xff]  }
  0x6c   :  { %946 = vmatprep.subr.bf16.mxu1 %v1781_v61  ;;  %v1868_v61 = vld [vmem:[#allocation5 + $0x3b4] ss:$8 sps:$4 sm:$0xff]  }
  0x6e   :  { %906 = vmatpush2.bf16.msra.mxu0 %v1783_v62  ;;  %v1863_v62 = vld [vmem:[#allocation5 + $0x2b0] ss:$8 sps:$4 sm:$0xff]  }
  0x6f   :  { %947 = vmatpush2.bf16.msra.mxu1 %v1784_v63  ;;  %907 = vmatprep.subr.bf16.mxu0 %v1785_v0  ;;  %v1866_v63 = vld [vmem:[#allocation5 + $0x3b0] ss:$8 sps:$4 sm:$0xff]   ;;  %v1871_v0 = vld [vmem:[#allocation5 + $0x2a4] ss:$8 sps:$4 sm:$0xff]  }
  0x70   :  { %948 = vmatprep.subr.bf16.mxu1 %v1787_v1  ;;  %v1874_v1 = vld [vmem:[#allocation5 + $0x3a4] ss:$8 sps:$4 sm:$0xff]  }
  0x72   :  { %908 = vmatpush2.bf16.msra.mxu0 %v1789_v2  ;;  %v1869_v2 = vld [vmem:[#allocation5 + $0x2a0] ss:$8 sps:$4 sm:$0xff]  }
  0x73   :  { %949 = vmatpush2.bf16.msra.mxu1 %v1790_v3  ;;  %959 = vmatprep.subr.bf16.mxu0 %v1793_v6  ;;  %v1872_v3 = vld [vmem:[#allocation5 + $0x3a0] ss:$8 sps:$4 sm:$0xff]   ;;  %v1875_v6 = vld [vmem:[#allocation5 + $0x290] ss:$8 sps:$4 sm:$0xff]  }
  0x74   :  { %1000 = vmatprep.subr.bf16.mxu1 %v1796_v7  ;;  %v1878_v7 = vld [vmem:[#allocation5 + $0x390] ss:$8 sps:$4 sm:$0xff]  }
  0x75   :  { %910 = vmatmul.mubr.bf16.vlgmr.msra.gmra.mxu0 %v89_v8  ;;  %v1883_v8 = vld [vmem:[#allocation5 + $0x284] ss:$8 sps:$4 sm:$0xff]  }
  0x76   :  { %951 = vmatmul.mubr.bf16.vlgmr.msra.gmra.mxu1 %v91_v9  ;;  %960 = vmatpush1.bf16.msra.mxu0 %v1791_v10  ;;  %v1886_v9 = vld [vmem:[#allocation5 + $0x384] ss:$8 sps:$4 sm:$0xff]   ;;  %v1881_v10 = vld [vmem:[#allocation5 + $0x280] ss:$8 sps:$4 sm:$0xff]  }
  0x77   :  { %1001 = vmatpush1.bf16.msra.mxu1 %v1794_v11  ;;  %961 = vmatprep.subr.bf16.mxu0 %v1799_v12  ;;  %v1884_v11 = vld [vmem:[#allocation5 + $0x380] ss:$8 sps:$4 sm:$0xff]  }
  0x78   :  { %1002 = vmatprep.subr.bf16.mxu1 %v1802_v13  ;;  %991 = vmatprep.mubr.bf16.mxu0 %v94_v38  ;;  %v85_v12 = vld [vmem:[#allocation2 + $0x20] sm:$0xff]  ;;  %v87_v13 = vld [vmem:[#allocation2 + $0x30] sm:$0xff] }
  0x79   :  { %1032 = vmatprep.mubr.bf16.mxu1 %v96_v41  ;;  %v1922_v38 = vld [vmem:[#allocation7 + $0xc4] ss:$8 sps:$4 sm:$0xff]   ;;  %v1923_v41 = vld [vmem:[#allocation7 + $0xb0] ss:$8 sps:$4 sm:$0xff]  }
  0x7a   :  { %962 = vmatpush1.bf16.msra.mxu0 %v1797_v14  ;;  %v93_v14 = vpack.c.bf16 %v85_v12, %v85_v12 }
  0x7b   :  { %1003 = vmatpush1.bf16.msra.mxu1 %v1800_v15  ;;  %963 = vmatprep.subr.bf16.mxu0 %v1805_v16  ;;  %v95_v15 = vpack.c.bf16 %v87_v13, %v87_v13  ;;  %v1887_v16 = vld [vmem:[#allocation7 + $0x70] ss:$8 sps:$4 sm:$0xff]  }
  0x7c   :  { %1004 = vmatprep.subr.bf16.mxu1 %v1808_v17  ;;  %v1889_v17 = vld [vmem:[#allocation7 + $0x74] ss:$8 sps:$4 sm:$0xff]  }
  0x7e   :  { %964 = vmatpush1.bf16.msra.mxu0 %v1803_v18  ;;  %v1892_v18 = vld [vmem:[#allocation7 + $0x64] ss:$8 sps:$4 sm:$0xff]  }
  0x7f   :  { %1005 = vmatpush1.bf16.msra.mxu1 %v1806_v19  ;;  %965 = vmatprep.subr.bf16.mxu0 %v1811_v20  ;;  %v1890_v19 = vld [vmem:[#allocation7 + $0x60] ss:$8 sps:$4 sm:$0xff]   ;;  %v1895_v20 = vld [vmem:[#allocation7 + $0x54] ss:$8 sps:$4 sm:$0xff]  }
  0x80   :  { %1006 = vmatprep.subr.bf16.mxu1 %v1814_v21  ;;  %v1893_v21 = vld [vmem:[#allocation7 + $0x50] ss:$8 sps:$4 sm:$0xff]  }
  0x82   :  { %966 = vmatpush1.bf16.msra.mxu0 %v1809_v22  ;;  %v1898_v22 = vld [vmem:[#allocation7 + $0x44] ss:$8 sps:$4 sm:$0xff]  }
  0x83   :  { %1007 = vmatpush1.bf16.msra.mxu1 %v1812_v23  ;;  %967 = vmatprep.subr.bf16.mxu0 %v1817_v24  ;;  %v1896_v23 = vld [vmem:[#allocation7 + $0x40] ss:$8 sps:$4 sm:$0xff]   ;;  %v1901_v24 = vld [vmem:[#allocation7 + $0x34] ss:$8 sps:$4 sm:$0xff]  }
  0x84   :  { %1008 = vmatprep.subr.bf16.mxu1 %v1820_v25  ;;  %v1899_v25 = vld [vmem:[#allocation7 + $0x30] ss:$8 sps:$4 sm:$0xff]  }
  0x86   :  { %968 = vmatpush1.bf16.msra.mxu0 %v1815_v26  ;;  %v1904_v26 = vld [vmem:[#allocation7 + $0x24] ss:$8 sps:$4 sm:$0xff]  }
  0x87   :  { %1009 = vmatpush1.bf16.msra.mxu1 %v1818_v27  ;;  %969 = vmatprep.subr.bf16.mxu0 %v1823_v28  ;;  %v1902_v27 = vld [vmem:[#allocation7 + $0x20] ss:$8 sps:$4 sm:$0xff]   ;;  %v1907_v28 = vld [vmem:[#allocation7 + $0x14] ss:$8 sps:$4 sm:$0xff]  }
  0x88   :  { %1010 = vmatprep.subr.bf16.mxu1 %v1826_v29  ;;  %v1905_v29 = vld [vmem:[#allocation7 + $0x10] ss:$8 sps:$4 sm:$0xff]  }
  0x8a   :  { %970 = vmatpush1.bf16.msra.mxu0 %v1821_v30  ;;  %v1910_v30 = vld [vmem:[#allocation7 + $0x4] ss:$8 sps:$4 sm:$0xff]  }
  0x8b   :  { %1011 = vmatpush1.bf16.msra.mxu1 %v1824_v31  ;;  %971 = vmatprep.subr.bf16.mxu0 %v1829_v32  ;;  %v1908_v31 = vld [vmem:[#allocation7] ss:$8 sps:$4 sm:$0xff]   ;;  %v1913_v32 = vld [vmem:[#allocation7 + $0xf4] ss:$8 sps:$4 sm:$0xff]  }
  0x8c   :  { %1012 = vmatprep.subr.bf16.mxu1 %v1832_v33  ;;  %v1911_v33 = vld [vmem:[#allocation7 + $0xf0] ss:$8 sps:$4 sm:$0xff]  }
  0x8e   :  { %972 = vmatpush1.bf16.msra.mxu0 %v1827_v34  ;;  %v1916_v34 = vld [vmem:[#allocation7 + $0xe4] ss:$8 sps:$4 sm:$0xff]  }
  0x8f   :  { %1013 = vmatpush1.bf16.msra.mxu1 %v1830_v36  ;;  %973 = vmatprep.subr.bf16.mxu0 %v1835_v37  ;;  %v1919_v36 = vld [vmem:[#allocation7 + $0xd4] ss:$8 sps:$4 sm:$0xff]   ;;  %v1917_v37 = vld [vmem:[#allocation7 + $0xd0] ss:$8 sps:$4 sm:$0xff]  }
  0x90   :  { %1014 = vmatprep.subr.bf16.mxu1 %v1838_v40  ;;  %v1925_v40 = vld [vmem:[#allocation7 + $0xb4] ss:$8 sps:$4 sm:$0xff]  }
  0x92   :  { %974 = vmatpush1.bf16.msra.mxu0 %v1833_v42  ;;  %v1928_v42 = vld [vmem:[#allocation7 + $0xa4] ss:$8 sps:$4 sm:$0xff]  }
  0x93   :  { %1015 = vmatpush1.bf16.msra.mxu1 %v1836_v43  ;;  %975 = vmatprep.subr.bf16.mxu0 %v1841_v44  ;;  %v1926_v43 = vld [vmem:[#allocation7 + $0xa0] ss:$8 sps:$4 sm:$0xff]   ;;  %v1931_v44 = vld [vmem:[#allocation7 + $0x94] ss:$8 sps:$4 sm:$0xff]  }
  0x94   :  { %1016 = vmatprep.subr.bf16.mxu1 %v1844_v45  ;;  %v1929_v45 = vld [vmem:[#allocation7 + $0x90] ss:$8 sps:$4 sm:$0xff]  }
  0x96   :  { %976 = vmatpush2.bf16.msra.mxu0 %v1839_v46  ;;  %v1934_v46 = vld [vmem:[#allocation7 + $0x84] ss:$8 sps:$4 sm:$0xff]  }
  0x97   :  { %1017 = vmatpush2.bf16.msra.mxu1 %v1842_v47  ;;  %977 = vmatprep.subr.bf16.mxu0 %v1847_v48  ;;  %v1932_v47 = vld [vmem:[#allocation7 + $0x80] ss:$8 sps:$4 sm:$0xff]   ;;  %v1935_v48 = vld [vmem:[#allocation8 + $0x78] sm:$0xff]  }
  0x98   :  { %1018 = vmatprep.subr.bf16.mxu1 %v1850_v49  ;;  %v1936_v49 = vld [vmem:[#allocation8 + $0x38] sm:$0xff]  }
  0x9a   :  { %978 = vmatpush2.bf16.msra.mxu0 %v1845_v50  ;;  %v1937_v50 = vld [vmem:[#allocation8 + $0x70] sm:$0xff]  }
  0x9b   :  { %1019 = vmatpush2.bf16.msra.mxu1 %v1848_v51  ;;  %979 = vmatprep.subr.bf16.mxu0 %v1853_v52  ;;  %v1938_v51 = vld [vmem:[#allocation8 + $0x30] sm:$0xff]   ;;  %v1939_v52 = vld [vmem:[#allocation8 + $0x68] sm:$0xff]  }
  0x9c   :  { %1020 = vmatprep.subr.bf16.mxu1 %v1856_v53  ;;  %v1940_v53 = vld [vmem:[#allocation8 + $0x28] sm:$0xff]  }
  0x9e   :  { %980 = vmatpush2.bf16.msra.mxu0 %v1851_v54  ;;  %v1941_v54 = vld [vmem:[#allocation8 + $0x60] sm:$0xff]  }
  0x9f   :  { %1021 = vmatpush2.bf16.msra.mxu1 %v1854_v55  ;;  %981 = vmatprep.subr.bf16.mxu0 %v1859_v56  ;;  %v1942_v55 = vld [vmem:[#allocation8 + $0x20] sm:$0xff]   ;;  %v1943_v56 = vld [vmem:[#allocation8 + $0x58] sm:$0xff]  }
  0xa0   :  { %1022 = vmatprep.subr.bf16.mxu1 %v1862_v57  ;;  %v1944_v57 = vld [vmem:[#allocation8 + $0x18] sm:$0xff]  }
  0xa2   :  { %982 = vmatpush2.bf16.msra.mxu0 %v1857_v58  ;;  %v1945_v58 = vld [vmem:[#allocation8 + $0x50] sm:$0xff]  }
  0xa3   :  { %1023 = vmatpush2.bf16.msra.mxu1 %v1860_v59  ;;  %983 = vmatprep.subr.bf16.mxu0 %v1865_v60  ;;  %v1946_v59 = vld [vmem:[#allocation8 + $0x10] sm:$0xff]  }
  0xa4   :  { %1024 = vmatprep.subr.bf16.mxu1 %v1868_v61 }
  0xa6   :  { %984 = vmatpush2.bf16.msra.mxu0 %v1863_v62 }
  0xa7   :  { %1025 = vmatpush2.bf16.msra.mxu1 %v1866_v63  ;;  %985 = vmatprep.subr.bf16.mxu0 %v1871_v0 }
  0xa8   :  { %1026 = vmatprep.subr.bf16.mxu1 %v1874_v1 }
  0xaa   :  { %986 = vmatpush2.bf16.msra.mxu0 %v1869_v2 }
  0xab   :  { %1027 = vmatpush2.bf16.msra.mxu1 %v1872_v3  ;;  %987 = vmatprep.subr.bf16.mxu0 %v1877_v4  ;;  %v227_v4 = vlaneseq }
  0xac   :  { %1028 = vmatprep.subr.bf16.mxu1 %v1880_v5 }
  0xad   :  { %v228_v5 = vshrl.u32 %v227_v4, 7 }
  0xae   :  { %988 = vmatpush2.bf16.msra.mxu0 %v1875_v6 }
  0xaf   :  { %1029 = vmatpush2.bf16.msra.mxu1 %v1878_v7  ;;  %989 = vmatprep.subr.bf16.mxu0 %v1883_v8  ;;  %v229_v6 = vsub.s32 0, %v228_v5  ;;  %v225_v7 = vld [vmem:[%s2134_s2] sm:$0x3]  ;;  %v233_v8 = vsub.s32 1, %v228_v5 }
  0xb0   :  { %1030 = vmatprep.subr.bf16.mxu1 %v1886_v9 }
  0xb1   :  { %v230_v9 = vrot.slane %v225_v7, %v229_v6 }
  0xb2   :  { %990 = vmatpush2.bf16.msra.mxu0 %v1881_v10  ;;  %v234_v10 = vrot.slane %v225_v7, %v233_v8 }
  0xb3   :  { %1031 = vmatpush2.bf16.msra.mxu1 %v1884_v11  ;;  %1249 = vmatprep.subr.bf16.mxu0 %v1889_v17 }
  0xb4   :  { %1664 = vmatprep.subr.bf16.mxu1 %v1935_v48 }
  0xb5   :  { %992 = vmatmul.mubr.bf16.vlgmr.msra.gmra.mxu0 %v93_v14 }
  0xb6   :  { %1033 = vmatmul.mubr.bf16.vlgmr.msra.gmra.mxu1 %v95_v15  ;;  %1250 = vmatpush1.bf16.msra.mxu0 %v1887_v16 }
  0xb7   :  { %1251 = vmatprep.subr.bf16.mxu0 %v1892_v18  ;;  %1665 = vmatpush3.bf16.msra.mxu1 %v1936_v49  ;;  %v1647_v49 = vld [vmem:[%s2138_s6] ss:$0 sm:$0xff] }
  0xb8   :  { %1666 = vmatprep.subr.bf16.mxu1 %v1937_v50 }
  0xba   :  { %1252 = vmatpush1.bf16.msra.mxu0 %v1890_v19 }
  0xbb   :  { %1253 = vmatprep.subr.bf16.mxu0 %v1895_v20  ;;  %1667 = vmatpush3.bf16.msra.mxu1 %v1938_v51 }
  0xbc   :  { %1668 = vmatprep.subr.bf16.mxu1 %v1939_v52 }
  0xbe   :  { %1254 = vmatpush1.bf16.msra.mxu0 %v1893_v21 }
  0xbf   :  { %1255 = vmatprep.subr.bf16.mxu0 %v1898_v22  ;;  %1669 = vmatpush3.bf16.msra.mxu1 %v1940_v53 }
  0xc0   :  { %1670 = vmatprep.subr.bf16.mxu1 %v1941_v54 }
  0xc2   :  { %1256 = vmatpush1.bf16.msra.mxu0 %v1896_v23 }
  0xc3   :  { %1257 = vmatprep.subr.bf16.mxu0 %v1901_v24  ;;  %1671 = vmatpush3.bf16.msra.mxu1 %v1942_v55 }
  0xc4   :  { %1672 = vmatprep.subr.bf16.mxu1 %v1943_v56 }
  0xc6   :  { %1258 = vmatpush1.bf16.msra.mxu0 %v1899_v25 }
  0xc7   :  { %1259 = vmatprep.subr.bf16.mxu0 %v1904_v26  ;;  %1673 = vmatpush3.bf16.msra.mxu1 %v1944_v57 }
  0xc8   :  { %1674 = vmatprep.subr.bf16.mxu1 %v1945_v58 }
  0xca   :  { %1260 = vmatpush1.bf16.msra.mxu0 %v1902_v27 }
  0xcb   :  { %1261 = vmatprep.subr.bf16.mxu0 %v1907_v28  ;;  %1675 = vmatpush3.bf16.msra.mxu1 %v1946_v59 }
  0xce   :  { %1262 = vmatpush1.bf16.msra.mxu0 %v1905_v29 }
  0xcf   :  { %1263 = vmatprep.subr.bf16.mxu0 %v1910_v30 }
  0xd2   :  { %1264 = vmatpush1.bf16.msra.mxu0 %v1908_v31  ;;  %v1947_v31 = vld [vmem:[#allocation8 + $0x48] sm:$0xff]  }
  0xd3   :  { %1265 = vmatprep.subr.bf16.mxu0 %v1913_v32  ;;  %v1948_v32 = vld [vmem:[#allocation8 + $0x8] sm:$0xff]   ;;  %1676 = vmatprep.subr.bf16.mxu1 %v1947_v31 }
  0xd4   :  { %1677 = vmatpush3.bf16.msra.mxu1 %v1948_v32 }
  0xd6   :  { %1266 = vmatpush2.bf16.msra.mxu0 %v1911_v33  ;;  %v1949_v33 = vld [vmem:[#allocation8 + $0x40] sm:$0xff]  }
  0xd7   :  { %1267 = vmatprep.subr.bf16.mxu0 %v1916_v34  ;;  %v1950_v34 = vld [vmem:[#allocation8] sm:$0xff]   ;;  %1678 = vmatprep.subr.bf16.mxu1 %v1949_v33 }
  0xd8   :  { %1679 = vmatpush3.bf16.msra.mxu1 %v1950_v34 }
  0xda   :  { %1268 = vmatpush2.bf16.msra.mxu0 %v1914_v35  ;;  %v1077_v35 = vld [vmem:[%s2136_s4] sm:$0x3]  ;;  %s2067_s4 = smov [#allocation10]  }
  0xdb   :  { %1269 = vmatprep.subr.bf16.mxu0 %v1919_v36  ;;  %v1082_v36 = vrot.slane %v1077_v35, %v229_v6  ;;  %s1476_s26 = sshll.u32 %s2067_s4, 4  ;;  %s1477_s26 = int_to_ptr.vmem [resolvable:$true] %s1476_s26 }
  0xdc   :  { %s2031_s27 = scalar_lea.vmem %s1477_s26, 128  ;;  %p2036_p7 = scmp.lt.s32.totalorder %s1477_s26, %s1477_s26 }
  0xdd   :  { %p2032_p6 = scmp.ne.s32.totalorder %s1477_s26, %s2031_s27  ;;  %p2037_p8 = scmp.lt.s32.totalorder %s2031_s27, %s2031_s27 }
  0xde   :  { %1270 = vmatpush2.bf16.msra.mxu0 %v1917_v37  ;;  %v1086_v37 = vrot.slane %v1077_v35, %v233_v8 }
  0xdf   :  { %1271 = vmatprep.subr.bf16.mxu0 %v1922_v38  ;;  %p2038_p9 = por %p2037_p8, %p2036_p7 }
  0xe1   :  { %p2039_p10 = pnand %p2038_p9, %p2032_p6 }
  0xe2   :  { %1272 = vmatpush2.bf16.msra.mxu0 %v1920_v39 }
  0xe3   :  { %1273 = vmatprep.subr.bf16.mxu0 %v1925_v40 }
  0xe6   :  { %1274 = vmatpush2.bf16.msra.mxu0 %v1923_v41 }
  0xe7   :  { %1275 = vmatprep.subr.bf16.mxu0 %v1928_v42 }
  0xea   :  { %1276 = vmatpush2.bf16.msra.mxu0 %v1926_v43 }
  0xeb   :  { %1277 = vmatprep.subr.bf16.mxu0 %v1931_v44 }
  0xee   :  { %1278 = vmatpush2.bf16.msra.mxu0 %v1929_v45 }
  0xef   :  { %1279 = vmatprep.subr.bf16.mxu0 %v1934_v46 }
  0xf2   :  { %1280 = vmatpush2.bf16.msra.mxu0 %v1932_v47 }
 0x135   :  { %v911_v60 = vpop.f32.mrf.mxu0 }
 0x136   :  { %v952_v61 = vpop.f32.mrf.mxu1  ;;  %v912_v11 = vadd.f32 %v911_v60, %v230_v9 }
 0x137   :  { %v913_v62 = vpop.f32.mrf.mxu0 }
 0x138   :  { %v954_v63 = vpop.f32.mrf.mxu1  ;;  %v914_v12 = vadd.f32 %v913_v62, %v234_v10  ;;  %v953_v13 = vadd.f32 %v952_v61, %v912_v11 }
 0x139   :  { %v915_v0 = vpop.f32.mrf.mxu0 }
 0x13a   :  { %v956_v1 = vpop.f32.mrf.mxu1  ;;  %v955_v16 = vadd.f32 %v954_v63, %v914_v12 }
 0x13b   :  { %v916_v2 = vpop.f32.mrf.mxu0 }
 0x13c   :  { %v957_v3 = vpop.f32.mrf.mxu1 }
 0x175   :  { %v993_v14 = vpop.f32.mrf.mxu0 }
 0x176   :  { %v1034_v15 = vpop.f32.mrf.mxu1  ;;  %v994_v17 = vadd.f32 %v993_v14, %v953_v13 }
 0x177   :  { %v995_v18 = vpop.f32.mrf.mxu0 }
 0x178   :  { %v1036_v19 = vpop.f32.mrf.mxu1  ;;  %v1035_v20 = vadd.f32 %v1034_v15, %v994_v17  ;;  %v996_v21 = vadd.f32 %v995_v18, %v955_v16 }
 0x179   :  { %v997_v22 = vpop.f32.mrf.mxu0 }
 0x17a   :  { %v1038_v23 = vpop.f32.mrf.mxu1  ;;  %v1037_v24 = vadd.f32 %v1036_v19, %v996_v21  ;;  %v1041_v25 = vmax.f32 %v1035_v20, 0.0 }
 0x17b   :  { %v998_v26 = vpop.f32.mrf.mxu0 }
 0x17c   :  { %v1039_v27 = vpop.f32.mrf.mxu1  ;;  %v1042_v28 = vmax.f32 %v1037_v24, 0.0  ;;  %v1043_v30 = vpack.c.bf16 %v1041_v25, %v1041_v25 }
 0x17e   :  { %v1044_v29 = vpack.c.bf16 %v1042_v28, %v1042_v28 }
 0x180   :  { %1281 = vmatprep.mubr.bf16.mxu0 %v1044_v29 }
 0x181   :  { %1282 = vmatmul.mubr.bf16.vlgmr.msra.gmra.mxu0 %v1043_v30 }
 0x241   :  { %v1283_v38 = vpop.f32.mrf.mxu0 }
 0x242   :  { %v1284_v39 = vadd.f32 %v1283_v38, %v1082_v36 }
 0x243   :  { %v1285_v40 = vpop.f32.mrf.mxu0 }
 0x244   :  { %v1286_v41 = vadd.f32 %v1285_v40, %v1086_v37  ;;  %v1290_v42 = vmax.f32 %v1284_v39, 0.0 }
 0x245   :  { %v1287_v43 = vpop.f32.mrf.mxu0 }
 0x246   :  { %v1291_v44 = vmax.f32 %v1286_v41, 0.0  ;;  %v1292_v47 = vpack.c.bf16 %v1290_v42, %v1290_v42 }
 0x247   :  { %v1288_v45 = vpop.f32.mrf.mxu0 }
 0x248   :  { %v1293_v46 = vpack.c.bf16 %v1291_v44, %v1291_v44 }
 0x24a   :  { %1461 = vmatprep.mubr.bf16.mxu1 %v1293_v46 }
 0x24b   :  { %1462 = vmatmul.mubr.bf16.vlgmr.msra.gmra.mxu1 %v1292_v47 }
 0x30b   :  { %v1680_v48 = vpop.f32.mrf.mxu1 }
 0x30d   :  { %v1681_v50 = vpop.f32.mrf.mxu1 }
 0x30e   :  { %v1682_v51 = vadd.f32 %v1681_v50, %v1680_v48 }
 0x30f   :  { %v1683_v52 = vpop.f32.mrf.mxu1 }
 0x310   :  { %v1464_v53 = vadd.f32 %v1682_v51, %v1647_v49 }
 0x311   :  { %v1684_v54 = vpop.f32.mrf.mxu1 }
 0x312   :  { %1469 = vst [vmem:[#allocation10] sm:$0xff] %v1464_v53 }
 0x313   :  { %2042 = shalt.err (!%p2039_p10)
}
 0x314   :  { %1479 = dma.vmem_to_hbm [thread:$0]  %s1477_s26, 128, %s2139_s7, [#allocation4]  }
 0x315   :  { %2057 = dma.done.wait [#allocation4], 128  }
 0x316   :  { %2058 = vsyncadd [#allocation4], 4294967168 }
 0x317   :  { %1483 = vsyncpa [#allocation3], 1 }
 0x318   :  { %1484 = vsyncpa [#allocation6], 1 }
 0x319   :  { %1485 = vsyncpa [#allocation9], 1 }
 0x31a   :  { %1486 = vsyncpa [#allocation4], 1 }

</bundles_post_ra>
